<compile_context>
chip_gen: v5e
topology: v5e:2x2
jax: 0.10.0
libtpu: 0.0.40
codegen_flags: <defaults>
</compile_context>

<pallas_src>
import functools

import jax
import jax.numpy as jnp
from jax import lax
from jax.experimental import pallas as pl
from jax.experimental.pallas import tpu as pltpu


def _concat_poincare_kernel(x_ref, wt_ref, o_ref, *, c, d1, d_out):
    # c is a compile-time Python float (module ctor constant); a traced/learned
    # c would instead be passed via scalar prefetch (SMEM).
    sqrt_c = c ** 0.5
    inv_sqrt_c = 1.0 / sqrt_c
    maxnorm = (1.0 - 1e-3) / sqrt_c

    x = x_ref[...].astype(jnp.float32)            # (tn, d1+d2) = [x1 | x2]
    wt = wt_ref[...]                              # (d1+d2, 2*d_out), bf16 block-diag

    # One wide MXU pass (bf16 operands, f32 accumulation) produces both
    # branches side by side: mx = [x1 @ W1.T | x2 @ W2.T].
    mx = jnp.dot(x.astype(jnp.bfloat16), wt,
                 preferred_element_type=jnp.float32)          # (tn, 2*d_out)

    # Per-branch ||x||^2 via one lane-masked reduce + one total reduce.
    xx = x * x
    lane = lax.broadcasted_iota(jnp.int32, xx.shape, 1)
    x1_ss = jnp.sum(jnp.where(lane < d1, xx, 0.0), axis=-1, keepdims=True)
    x2_ss = jnp.sum(xx, axis=-1, keepdims=True) - x1_ss

    mx1 = mx[:, :d_out]
    mx2 = mx[:, d_out:]

    def branch_scale(x_ss, mxb):
        # mobius_matvec + project, returned as the per-row scalar s (h = s*mxb)
        # plus the analytic ||h||^2 = s^2 * ||mxb||^2 (no extra reductions).
        x_ss = jnp.maximum(x_ss, 1e-10)           # clamp_min(||x||, 1e-5)^2
        inv_x_norm = lax.rsqrt(x_ss)              # EUP
        x_norm = x_ss * inv_x_norm

        mx_ss = jnp.sum(mxb * mxb, axis=-1, keepdims=True)
        nonzero = mx_ss > 0.0                     # torch's all(mx == 0) mask
        inv_mx_norm = lax.rsqrt(jnp.where(nonzero, mx_ss, 1.0))   # EUP, safe at 0
        mx_norm = mx_ss * inv_mx_norm

        # artanh(sqrt_c * ||x||): argument >= 0, only the upper clamp needed
        a = jnp.minimum(sqrt_c * x_norm, 1.0 - 1e-5)
        art = 0.5 * (jnp.log(1.0 + a) - jnp.log(1.0 - a))

        # tanh clamp: argument >= 0, keep only the upper bound
        arg = jnp.minimum(mx_norm * inv_x_norm * art, 15.0)
        t = jnp.tanh(arg)                          # EUP

        # res = tanh(arg) * mx / (||mx|| * sqrt_c); all-zero rows -> 0
        s = jnp.where(nonzero, t * inv_mx_norm * inv_sqrt_c, 0.0)

        # project(): ||res|| == tanh(arg)/sqrt_c analytically -> no 2nd reduction
        res_norm = jnp.maximum(t * inv_sqrt_c, 1e-5)
        s = s * jnp.where(res_norm > maxnorm, maxnorm / res_norm, 1.0)

        h_ss = (s * s) * mx_ss
        return s, h_ss

    s1, h1_ss = branch_scale(x1_ss, mx1)
    s2, h2_ss = branch_scale(x2_ss, mx2)

    # mobius_add(h1, h2, c) with the scale columns folded in (h_i = s_i * mx_i);
    # only <mx1, mx2> needs a real reduction.
    xy = (s1 * s2) * jnp.sum(mx1 * mx2, axis=-1, keepdims=True)
    denom = 1.0 + 2.0 * c * xy + (c * c) * h1_ss * h2_ss + 1e-5
    inv_denom = pl.reciprocal(denom, approx=False)             # (tn, 1) column only
    coef1 = (1.0 + 2.0 * c * xy + c * h2_ss) * s1 * inv_denom  # (tn, 1)
    coef2 = (1.0 - c * h1_ss) * s2 * inv_denom                 # (tn, 1)
    o_ref[...] = (coef1 * mx1 + coef2 * mx2).astype(o_ref.dtype)


def _forward_impl(x1, x2, w1, w2, c):
    d1, d2 = x1.shape[-1], x2.shape[-1]
    d_out = w1.shape[0]
    assert w1.shape == (d_out, d1) and w2.shape == (d_out, d2)
    lead = x1.shape[:-1]
    assert x2.shape[:-1] == lead
    d_in = d1 + d2
    out_dtype = x1.dtype

    # Single fused input stream [x1 | x2] (lets one wide matmul feed both
    # branches) — built under jit so it fuses with the padding below.
    x12 = jnp.concatenate([x1.reshape(-1, d1), x2.reshape(-1, d2)], axis=-1)
    n = x12.shape[0]

    # Block-diagonal stacked weight (d1+d2, 2*d_out): one MXU operand that
    # emits [x1@W1.T | x2@W2.T].  bf16 (it only feeds the bf16 matmul) and
    # built under jit so XLA const-folds the transpose/scatter.
    wt = jnp.zeros((d_in, 2 * d_out), jnp.float32)
    wt = wt.at[:d1, :d_out].set(jnp.asarray(w1, jnp.float32).T)
    wt = wt.at[d1:, d_out:].set(jnp.asarray(w2, jnp.float32).T)
    wt = wt.astype(jnp.bfloat16)

    # Row tile: ~4 MiB streamed per grid step (amortizes ~0.35us/step overhead
    # even at v7x HBM speed), multiple of 8 rows, capped at 4096 rows, every
    # block full (no masked partial stores), and >=2 grid steps when possible
    # so dimension_semantics=("parallel",) can use both v7x TensorCores.
    bytes_per_row = (d_in + d_out) * 4
    tn = max(8, min(4096, ((4 * 1024 * 1024) // bytes_per_row) // 8 * 8))
    n8 = ((n + 7) // 8) * 8
    tn = min(tn, n8)
    if n8 >= 16:
        tn = min(tn, ((n8 // 2 + 7) // 8) * 8)
    n_pad = ((n + tn - 1) // tn) * tn
    if n_pad != n:
        x12 = jnp.pad(x12, ((0, n_pad - n), (0, 0)))   # zero rows are numerically safe

    grid = (n_pad // tn,)
    out = pl.pallas_call(
        functools.partial(_concat_poincare_kernel, c=float(c), d1=d1, d_out=d_out),
        out_shape=jax.ShapeDtypeStruct((n_pad, d_out), out_dtype),
        grid_spec=pltpu.PrefetchScalarGridSpec(
            num_scalar_prefetch=0,
            grid=grid,
            in_specs=[
                pl.BlockSpec((tn, d_in), lambda i: (i, 0)),
                pl.BlockSpec((d_in, 2 * d_out), lambda i: (0, 0)),  # weights resident
            ],
            out_specs=pl.BlockSpec((tn, d_out), lambda i: (i, 0)),
        ),
        compiler_params=pltpu.CompilerParams(
            dimension_semantics=("parallel",),
            vmem_limit_bytes=32 * 1024 * 1024,
        ),
        cost_estimate=pl.CostEstimate(
            flops=2 * n_pad * d_in * (2 * d_out) + 16 * n_pad * d_out,
            transcendentals=10 * n_pad,
            bytes_accessed=n_pad * (d_in + d_out) * 4 + d_in * 2 * d_out * 2,
        ),
    )(x12, wt)
    return out[:n].reshape(lead + (d_out,))


concat_poincare_forward = jax.jit(_forward_impl, static_argnames=("c",))


# ---------------- pure-JAX reference (mirrors the PyTorch code) ----------------
def _ref_project(x, c):
    norm = jnp.maximum(jnp.linalg.norm(x, axis=-1, keepdims=True), 1e-5)
    maxnorm = (1.0 - 1e-3) / c ** 0.5
    return jnp.where(norm > maxnorm, x / norm * maxnorm, x)


def _ref_mobius_matvec(m, x, c):
    sqrt_c = c ** 0.5
    x_norm = jnp.maximum(jnp.linalg.norm(x, axis=-1, keepdims=True), 1e-5)
    mx = jnp.dot(x, m.T, precision=lax.Precision.HIGHEST)
    mx_norm = jnp.linalg.norm(mx, axis=-1, keepdims=True)
    a = jnp.clip(sqrt_c * x_norm, -1.0 + 1e-5, 1.0 - 1e-5)
    art = 0.5 * (jnp.log(1.0 + a) - jnp.log(1.0 - a))
    arg = jnp.clip(mx_norm / x_norm * art, -15.0, 15.0)
    res_c = jnp.tanh(arg) * mx / (mx_norm * sqrt_c)
    cond = jnp.all(mx == 0, axis=-1, keepdims=True)
    res = jnp.where(cond, jnp.zeros((), res_c.dtype), res_c)
    return _ref_project(res, c)


def _ref_mobius_add(x, y, c):
    x2 = jnp.sum(x * x, axis=-1, keepdims=True)
    y2 = jnp.sum(y * y, axis=-1, keepdims=True)
    xy = jnp.sum(x * y, axis=-1, keepdims=True)
    num = (1 + 2 * c * xy + c * y2) * x + (1 - c * x2) * y
    denom = 1 + 2 * c * xy + c ** 2 * x2 * y2
    return num / (denom + 1e-5)


def _reference(x1, x2, w1, w2, c):
    h1 = _ref_project(_ref_mobius_matvec(w1, x1, c), c)   # HypLinear(bias=False)
    h2 = _ref_project(_ref_mobius_matvec(w2, x2, c), c)
    return _ref_mobius_add(h1, h2, c)


if __name__ == "__main__":
    key = jax.random.PRNGKey(0)
    k1, k2, k3, k4 = jax.random.split(key, 4)
    d1, d2, d_out, c = 32, 48, 128, 1.0
    batch = (2, 8)

    x1 = jax.random.normal(k1, batch + (d1,), dtype=jnp.float32) * 0.1
    x2 = jax.random.normal(k2, batch + (d2,), dtype=jnp.float32) * 0.1
    w1 = jax.random.normal(k3, (d_out, d1), dtype=jnp.float32) * (1.0 / d1 ** 0.5)
    w2 = jax.random.normal(k4, (d_out, d2), dtype=jnp.float32) * (1.0 / d2 ** 0.5)

    y = concat_poincare_forward(x1, x2, w1, w2, c=c)
    jax.block_until_ready(y)

    y_ref = _reference(x1, x2, w1, w2, c)
    assert y.shape == batch + (d_out,) and y.dtype == x1.dtype
    assert bool(jnp.all(jnp.isfinite(y)))
    # Tolerance reflects the single-pass bf16 MXU matmul (f32 accumulation)
    # versus the f32/HIGHEST reference, per the perf review.
    assert jnp.allclose(y, y_ref, atol=2e-3, rtol=2e-3), float(
        jnp.max(jnp.abs(y - y_ref)))
    print("KERNEL_OK")
</pallas_src>

<mosaic_0001>
module attributes {stable_mosaic.version = 11 : i64} {
  func.func @_concat_poincare_kernel(%arg0: i32, %arg1: memref<8x80xf32, #tpu.memory_space<vmem>>, %arg2: memref<80x256xbf16, #tpu.memory_space<vmem>>, %arg3: memref<8x128xf32, #tpu.memory_space<vmem>>) attributes {dimension_semantics = [#tpu.dimension_semantics<parallel>], iteration_bounds = array<i64: 2>, scalar_prefetch = 0 : i64, scratch_operands = 0 : i64, tpu.core_type = #tpu.core_type<tc>, window_params = [{transform_indices = @transform_0, window_bounds = array<i64: 8, 80>}, {pipeline_mode = #tpu.pipeline_mode<synchronous>, transform_indices = @transform_1, window_bounds = array<i64: 80, 256>}, {transform_indices = @transform_2, window_bounds = array<i64: 8, 128>}]} {
    %c0 = arith.constant 0 : index
    %c0_0 = arith.constant 0 : index
    %0 = vector.load %arg1[%c0, %c0_0] : memref<8x80xf32, #tpu.memory_space<vmem>>, vector<8x80xf32>
    %c0_1 = arith.constant 0 : index
    %c0_2 = arith.constant 0 : index
    %1 = vector.load %arg2[%c0_1, %c0_2] : memref<80x256xbf16, #tpu.memory_space<vmem>>, vector<80x256xbf16>
    %2 = arith.truncf %0 : vector<8x80xf32> to vector<8x80xbf16>
    %cst = arith.constant dense<0.000000e+00> : vector<8x256xf32>
    %3 = tpu.matmul %2, %1, %cst {dimension_numbers = #tpu.dot_dimension_numbers<[1], [0], [0], [1], [0, 0, 1, 1], [], []>} : vector<8x80xbf16>, vector<80x256xbf16>, vector<8x256xf32> -> vector<8x256xf32>
    %4 = arith.mulf %0, %0 : vector<8x80xf32>
    %5 = tpu.iota {dimensions = array<i32: 1>} : vector<8x80xi32>
    %c32_i32 = arith.constant 32 : i32
    %6 = vector.broadcast %c32_i32 : i32 to vector<8x80xi32>
    %7 = arith.cmpi slt, %5, %6 : vector<8x80xi32>
    %cst_3 = arith.constant 0.000000e+00 : f32
    %8 = vector.broadcast %cst_3 : f32 to vector<8x80xf32>
    %9 = arith.select %7, %4, %8 : vector<8x80xi1>, vector<8x80xf32>
    %cst_4 = arith.constant dense<0.000000e+00> : vector<8xf32>
    %10 = vector.multi_reduction <add>, %9, %cst_4 [1] : vector<8x80xf32> to vector<8xf32>
    %11 = vector.shape_cast %10 : vector<8xf32> to vector<8x1xf32>
    %cst_5 = arith.constant dense<0.000000e+00> : vector<8xf32>
    %12 = vector.multi_reduction <add>, %4, %cst_5 [1] : vector<8x80xf32> to vector<8xf32>
    %13 = vector.shape_cast %12 : vector<8xf32> to vector<8x1xf32>
    %14 = arith.subf %13, %11 : vector<8x1xf32>
    %15 = vector.extract_strided_slice %3 {offsets = [0, 0], sizes = [8, 128], strides = [1, 1]} : vector<8x256xf32> to vector<8x128xf32>
    %16 = vector.extract_strided_slice %3 {offsets = [0, 128], sizes = [8, 128], strides = [1, 1]} : vector<8x256xf32> to vector<8x128xf32>
    %cst_6 = arith.constant 1.000000e-10 : f32
    %17 = vector.broadcast %cst_6 : f32 to vector<8x1xf32>
    %18 = arith.maximumf %11, %17 : vector<8x1xf32>
    %19 = math.rsqrt %18 : vector<8x1xf32>
    %20 = arith.mulf %18, %19 : vector<8x1xf32>
    %21 = arith.mulf %15, %15 : vector<8x128xf32>
    %cst_7 = arith.constant dense<0.000000e+00> : vector<8xf32>
    %22 = vector.multi_reduction <add>, %21, %cst_7 [1] : vector<8x128xf32> to vector<8xf32>
    %23 = vector.shape_cast %22 : vector<8xf32> to vector<8x1xf32>
    %cst_8 = arith.constant 0.000000e+00 : f32
    %24 = vector.broadcast %cst_8 : f32 to vector<8x1xf32>
    %25 = arith.cmpf ogt, %23, %24 : vector<8x1xf32>
    %cst_9 = arith.constant 1.000000e+00 : f32
    %26 = vector.broadcast %cst_9 : f32 to vector<8x1xf32>
    %27 = arith.select %25, %23, %26 : vector<8x1xi1>, vector<8x1xf32>
    %28 = math.rsqrt %27 : vector<8x1xf32>
    %29 = arith.mulf %23, %28 : vector<8x1xf32>
    %cst_10 = arith.constant 1.000000e+00 : f32
    %30 = vector.broadcast %cst_10 : f32 to vector<8x1xf32>
    %31 = arith.mulf %30, %20 : vector<8x1xf32>
    %cst_11 = arith.constant 0.999989986 : f32
    %32 = vector.broadcast %cst_11 : f32 to vector<8x1xf32>
    %33 = arith.minimumf %31, %32 : vector<8x1xf32>
    %cst_12 = arith.constant 1.000000e+00 : f32
    %34 = vector.broadcast %cst_12 : f32 to vector<8x1xf32>
    %35 = arith.addf %34, %33 : vector<8x1xf32>
    %36 = math.log %35 : vector<8x1xf32>
    %cst_13 = arith.constant 1.000000e+00 : f32
    %37 = vector.broadcast %cst_13 : f32 to vector<8x1xf32>
    %38 = arith.subf %37, %33 : vector<8x1xf32>
    %39 = math.log %38 : vector<8x1xf32>
    %40 = arith.subf %36, %39 : vector<8x1xf32>
    %cst_14 = arith.constant 5.000000e-01 : f32
    %41 = vector.broadcast %cst_14 : f32 to vector<8x1xf32>
    %42 = arith.mulf %41, %40 : vector<8x1xf32>
    %43 = arith.mulf %29, %19 : vector<8x1xf32>
    %44 = arith.mulf %43, %42 : vector<8x1xf32>
    %cst_15 = arith.constant 1.500000e+01 : f32
    %45 = vector.broadcast %cst_15 : f32 to vector<8x1xf32>
    %46 = arith.minimumf %44, %45 : vector<8x1xf32>
    %47 = math.tanh %46 : vector<8x1xf32>
    %48 = arith.mulf %47, %28 : vector<8x1xf32>
    %cst_16 = arith.constant 1.000000e+00 : f32
    %49 = vector.broadcast %cst_16 : f32 to vector<8x1xf32>
    %50 = arith.mulf %48, %49 : vector<8x1xf32>
    %cst_17 = arith.constant 0.000000e+00 : f32
    %51 = vector.broadcast %cst_17 : f32 to vector<8x1xf32>
    %52 = arith.select %25, %50, %51 : vector<8x1xi1>, vector<8x1xf32>
    %cst_18 = arith.constant 1.000000e+00 : f32
    %53 = vector.broadcast %cst_18 : f32 to vector<8x1xf32>
    %54 = arith.mulf %47, %53 : vector<8x1xf32>
    %cst_19 = arith.constant 9.99999974E-6 : f32
    %55 = vector.broadcast %cst_19 : f32 to vector<8x1xf32>
    %56 = arith.maximumf %54, %55 : vector<8x1xf32>
    %cst_20 = arith.constant 9.990000e-01 : f32
    %57 = vector.broadcast %cst_20 : f32 to vector<8x1xf32>
    %58 = arith.cmpf ogt, %56, %57 : vector<8x1xf32>
    %cst_21 = arith.constant 9.990000e-01 : f32
    %59 = vector.broadcast %cst_21 : f32 to vector<8x1xf32>
    %60 = arith.divf %59, %56 : vector<8x1xf32>
    %cst_22 = arith.constant 1.000000e+00 : f32
    %61 = vector.broadcast %cst_22 : f32 to vector<8x1xf32>
    %62 = arith.select %58, %60, %61 : vector<8x1xi1>, vector<8x1xf32>
    %63 = arith.mulf %52, %62 : vector<8x1xf32>
    %64 = arith.mulf %63, %63 : vector<8x1xf32>
    %65 = arith.mulf %64, %23 : vector<8x1xf32>
    %cst_23 = arith.constant 1.000000e-10 : f32
    %66 = vector.broadcast %cst_23 : f32 to vector<8x1xf32>
    %67 = arith.maximumf %14, %66 : vector<8x1xf32>
    %68 = math.rsqrt %67 : vector<8x1xf32>
    %69 = arith.mulf %67, %68 : vector<8x1xf32>
    %70 = arith.mulf %16, %16 : vector<8x128xf32>
    %cst_24 = arith.constant dense<0.000000e+00> : vector<8xf32>
    %71 = vector.multi_reduction <add>, %70, %cst_24 [1] : vector<8x128xf32> to vector<8xf32>
    %72 = vector.shape_cast %71 : vector<8xf32> to vector<8x1xf32>
    %cst_25 = arith.constant 0.000000e+00 : f32
    %73 = vector.broadcast %cst_25 : f32 to vector<8x1xf32>
    %74 = arith.cmpf ogt, %72, %73 : vector<8x1xf32>
    %cst_26 = arith.constant 1.000000e+00 : f32
    %75 = vector.broadcast %cst_26 : f32 to vector<8x1xf32>
    %76 = arith.select %74, %72, %75 : vector<8x1xi1>, vector<8x1xf32>
    %77 = math.rsqrt %76 : vector<8x1xf32>
    %78 = arith.mulf %72, %77 : vector<8x1xf32>
    %cst_27 = arith.constant 1.000000e+00 : f32
    %79 = vector.broadcast %cst_27 : f32 to vector<8x1xf32>
    %80 = arith.mulf %79, %69 : vector<8x1xf32>
    %cst_28 = arith.constant 0.999989986 : f32
    %81 = vector.broadcast %cst_28 : f32 to vector<8x1xf32>
    %82 = arith.minimumf %80, %81 : vector<8x1xf32>
    %cst_29 = arith.constant 1.000000e+00 : f32
    %83 = vector.broadcast %cst_29 : f32 to vector<8x1xf32>
    %84 = arith.addf %83, %82 : vector<8x1xf32>
    %85 = math.log %84 : vector<8x1xf32>
    %cst_30 = arith.constant 1.000000e+00 : f32
    %86 = vector.broadcast %cst_30 : f32 to vector<8x1xf32>
    %87 = arith.subf %86, %82 : vector<8x1xf32>
    %88 = math.log %87 : vector<8x1xf32>
    %89 = arith.subf %85, %88 : vector<8x1xf32>
    %cst_31 = arith.constant 5.000000e-01 : f32
    %90 = vector.broadcast %cst_31 : f32 to vector<8x1xf32>
    %91 = arith.mulf %90, %89 : vector<8x1xf32>
    %92 = arith.mulf %78, %68 : vector<8x1xf32>
    %93 = arith.mulf %92, %91 : vector<8x1xf32>
    %cst_32 = arith.constant 1.500000e+01 : f32
    %94 = vector.broadcast %cst_32 : f32 to vector<8x1xf32>
    %95 = arith.minimumf %93, %94 : vector<8x1xf32>
    %96 = math.tanh %95 : vector<8x1xf32>
    %97 = arith.mulf %96, %77 : vector<8x1xf32>
    %cst_33 = arith.constant 1.000000e+00 : f32
    %98 = vector.broadcast %cst_33 : f32 to vector<8x1xf32>
    %99 = arith.mulf %97, %98 : vector<8x1xf32>
    %cst_34 = arith.constant 0.000000e+00 : f32
    %100 = vector.broadcast %cst_34 : f32 to vector<8x1xf32>
    %101 = arith.select %74, %99, %100 : vector<8x1xi1>, vector<8x1xf32>
    %cst_35 = arith.constant 1.000000e+00 : f32
    %102 = vector.broadcast %cst_35 : f32 to vector<8x1xf32>
    %103 = arith.mulf %96, %102 : vector<8x1xf32>
    %cst_36 = arith.constant 9.99999974E-6 : f32
    %104 = vector.broadcast %cst_36 : f32 to vector<8x1xf32>
    %105 = arith.maximumf %103, %104 : vector<8x1xf32>
    %cst_37 = arith.constant 9.990000e-01 : f32
    %106 = vector.broadcast %cst_37 : f32 to vector<8x1xf32>
    %107 = arith.cmpf ogt, %105, %106 : vector<8x1xf32>
    %cst_38 = arith.constant 9.990000e-01 : f32
    %108 = vector.broadcast %cst_38 : f32 to vector<8x1xf32>
    %109 = arith.divf %108, %105 : vector<8x1xf32>
    %cst_39 = arith.constant 1.000000e+00 : f32
    %110 = vector.broadcast %cst_39 : f32 to vector<8x1xf32>
    %111 = arith.select %107, %109, %110 : vector<8x1xi1>, vector<8x1xf32>
    %112 = arith.mulf %101, %111 : vector<8x1xf32>
    %113 = arith.mulf %112, %112 : vector<8x1xf32>
    %114 = arith.mulf %113, %72 : vector<8x1xf32>
    %115 = arith.mulf %63, %112 : vector<8x1xf32>
    %116 = arith.mulf %15, %16 : vector<8x128xf32>
    %cst_40 = arith.constant dense<0.000000e+00> : vector<8xf32>
    %117 = vector.multi_reduction <add>, %116, %cst_40 [1] : vector<8x128xf32> to vector<8xf32>
    %118 = vector.shape_cast %117 : vector<8xf32> to vector<8x1xf32>
    %119 = arith.mulf %115, %118 : vector<8x1xf32>
    %cst_41 = arith.constant 2.000000e+00 : f32
    %120 = vector.broadcast %cst_41 : f32 to vector<8x1xf32>
    %121 = arith.mulf %120, %119 : vector<8x1xf32>
    %cst_42 = arith.constant 1.000000e+00 : f32
    %122 = vector.broadcast %cst_42 : f32 to vector<8x1xf32>
    %123 = arith.addf %122, %121 : vector<8x1xf32>
    %cst_43 = arith.constant 1.000000e+00 : f32
    %124 = vector.broadcast %cst_43 : f32 to vector<8x1xf32>
    %125 = arith.mulf %124, %65 : vector<8x1xf32>
    %126 = arith.mulf %125, %114 : vector<8x1xf32>
    %127 = arith.addf %123, %126 : vector<8x1xf32>
    %cst_44 = arith.constant 9.99999974E-6 : f32
    %128 = vector.broadcast %cst_44 : f32 to vector<8x1xf32>
    %129 = arith.addf %127, %128 : vector<8x1xf32>
    %130 = tpu.reciprocal %129 : vector<8x1xf32> -> vector<8x1xf32>
    %cst_45 = arith.constant 2.000000e+00 : f32
    %131 = vector.broadcast %cst_45 : f32 to vector<8x1xf32>
    %132 = arith.mulf %131, %119 : vector<8x1xf32>
    %cst_46 = arith.constant 1.000000e+00 : f32
    %133 = vector.broadcast %cst_46 : f32 to vector<8x1xf32>
    %134 = arith.addf %133, %132 : vector<8x1xf32>
    %cst_47 = arith.constant 1.000000e+00 : f32
    %135 = vector.broadcast %cst_47 : f32 to vector<8x1xf32>
    %136 = arith.mulf %135, %114 : vector<8x1xf32>
    %137 = arith.addf %134, %136 : vector<8x1xf32>
    %138 = arith.mulf %137, %63 : vector<8x1xf32>
    %139 = arith.mulf %138, %130 : vector<8x1xf32>
    %cst_48 = arith.constant 1.000000e+00 : f32
    %140 = vector.broadcast %cst_48 : f32 to vector<8x1xf32>
    %141 = arith.mulf %140, %65 : vector<8x1xf32>
    %cst_49 = arith.constant 1.000000e+00 : f32
    %142 = vector.broadcast %cst_49 : f32 to vector<8x1xf32>
    %143 = arith.subf %142, %141 : vector<8x1xf32>
    %144 = arith.mulf %143, %112 : vector<8x1xf32>
    %145 = arith.mulf %144, %130 : vector<8x1xf32>
    %146 = vector.broadcast %139 : vector<8x1xf32> to vector<8x128xf32>
    %147 = arith.mulf %146, %15 : vector<8x128xf32>
    %148 = vector.broadcast %145 : vector<8x1xf32> to vector<8x128xf32>
    %149 = arith.mulf %148, %16 : vector<8x128xf32>
    %150 = arith.addf %147, %149 : vector<8x128xf32>
    %c0_50 = arith.constant 0 : index
    %c0_51 = arith.constant 0 : index
    %151 = vector.load %arg3[%c0_50, %c0_51] : memref<8x128xf32, #tpu.memory_space<vmem>>, vector<8x128xf32>
    tpu.vector_store %arg3[%c0_50, %c0_51], %150 {strides = array<i32>} : memref<8x128xf32, #tpu.memory_space<vmem>>, vector<8x128xf32>,
    return
  }
  func.func @transform_0(%arg0: i32) -> (i32, i32) {
    %c0_i32 = arith.constant 0 : i32
    %c0_i32_0 = arith.constant 0 : i32
    return %arg0, %c0_i32 : i32, i32
  }
  func.func @transform_1(%arg0: i32) -> (i32, i32) {
    %c0_i32 = arith.constant 0 : i32
    %c0_i32_0 = arith.constant 0 : i32
    %c0_i32_1 = arith.constant 0 : i32
    return %c0_i32, %c0_i32_0 : i32, i32
  }
  func.func @transform_2(%arg0: i32) -> (i32, i32) {
    %c0_i32 = arith.constant 0 : i32
    %c0_i32_0 = arith.constant 0 : i32
    return %arg0, %c0_i32 : i32, i32
  }
}

</mosaic_0001>

<bundles_post_ra>
// kernel: _forward_impl.1
= control target key start
LH: loop header
LB: loop body
LE: loop exit
PB: predicated region body
PF: predicated region fallthrough
CT: control target
= control target key end

     0   :  { %7 = vsyncpa [#allocation3], 0  ;;  %s868_s0 = inlined_call_operand.vmem [shape: f32[16,80], index: 0, kind: input, shape index: {}]   ;;  %s869_s1 = inlined_call_operand.vmem [shape: bf16[80,256], index: 1, kind: input, shape index: {}]   ;;  %s870_s2 = inlined_call_operand.hbm [shape: f32[16,128], index: 2, kind: output, shape index: {}]  }
   0x1   :  { %9 = vsyncpa [#allocation3 + $0x1], 0  ;;  %s687_s9 = smov 0   ;;  %s689_s10 = smov 0  }
   0x2   :  { %s691_s11 = smov 0   ;;  %s693_s12 = smov 0  }
   0x3 LB: > { %s708_s13 = sadd.s32 4294967295, %s670_s12   ;;  %s481_s14 = sadd.s32 4294967294, %s670_s12   ;;  %s670_s12 = sphi %s693_s12, %s876_s12   ;;  %s666_s11 = sphi %s691_s11, %s875_s11   ;;  %s662_s10 = sphi %s689_s10, %s874_s10   ;;  %s658_s9 = sphi %s687_s9, %s873_s9  }
   0x4   : > { %s712_s15 = sadd.s32 1, %s670_s12   ;;  %s69_s16 = sadd.s32 1, %s666_s11 }
   0x5   : > { %s66_s17 = ssub.s32 %s670_s12, %s712_s15  ;;  %p79_p0 = scmp.ne.s32.totalorder %s666_s11, %s662_s10 }
   0x6   : > { %p67_p1 = scmp.eq.s32.totalorder %s66_s17, 0  ;;  %p80_p2 = scmp.eq.s32.totalorder %s708_s13, 1 }
   0x7   : > { %p85_p3 = scmp.ne.s32.totalorder %s662_s10, %s658_s9  ;;  %p86_p4 = scmp.eq.s32.totalorder %s481_s14, 1 }
   0x8   : > { %s723_s18 = scalar_select %p67_p1, %s666_s11, %s69_s16  }
   0x9   : > { %p725_p5 = por %p80_p2, %p79_p0  ;;  %p729_p6 = por %p86_p4, %p85_p3 }
   0xa   : > { %p484_p7 = scmp.ge.s32.totalorder %s670_s12, 1  ;;  %p114_p8 = scmp.lt.s32.totalorder %s670_s12, 3 }
   0xc   : > { %p115_p9 = pnand %p484_p7, %p114_p8 }
   0xd   : > { %p135_p10 = scmp.lt.s32.totalorder (!%p115_p9), %s708_s13, 1  ;;  %s132_s28 = sand.u32 (!%p115_p9), 1, %s662_s10  }
   0xe   : > { %118 = sbr.rel (%p115_p9) target bundleno = 390 (0x186), region = 28  ;;  %s485_s29 = sshll.u32 (!%p115_p9), %s132_s28, 3 }
   0xf   : > { %s134_s6 = scalar_lea.vmem (!%p115_p9), [#allocation2], %s485_s29  ;;  %s407_s8 = scalar_lea.sflag (!%p115_p9), [#allocation3], %s132_s28 }
  0x10   : > { %s628_s22 = scalar_lea.hbm (!%p115_p9), %s870_s2, 16 }
  0x13   : > { %v521_v0 = vld [vmem:[%s869_s1 + $0x40] sm:$0xf]  ;;  %v542_v1 = vld [vmem:[%s869_s1 + $0x44] sm:$0xf0]  ;;  %v541_v2 = vld [vmem:[%s869_s1 + $0x44] sm:$0xf]  ;;  %v233_v14 = vlaneseq }
  0x14   : > { %v522_v3 = vor.u32 %v542_v1, %v521_v0  ;;  %v523_v4 = vld [vmem:[%s869_s1 + $0x48] sm:$0xf0]  ;;  %v513_v5 = vld [vmem:[%s869_s1 + $0x30] sm:$0xf]  ;;  %v540_v6 = vld [vmem:[%s869_s1 + $0x34] sm:$0xf0] }
  0x15   : > { %v526_v7 = vor.u32 %v541_v2, %v523_v4  ;;  %v539_v8 = vld [vmem:[%s869_s1 + $0x34] sm:$0xf]  ;;  %v515_v9 = vld [vmem:[%s869_s1 + $0x38] sm:$0xf0]  ;;  %v514_v10 = vor.u32 %v540_v6, %v513_v5  ;;  %v505_v12 = vld [vmem:[%s869_s1 + $0x20] sm:$0xf] }
  0x16   : > { %209 = vmatpush.bf16.msra.mxu0 %v522_v3  ;;  %v518_v11 = vor.u32 %v539_v8, %v515_v9  ;;  %v538_v13 = vld [vmem:[%s869_s1 + $0x24] sm:$0xf0]  ;;  %v537_v15 = vld [vmem:[%s869_s1 + $0x24] sm:$0xf]  ;;  %v507_v16 = vld [vmem:[%s869_s1 + $0x28] sm:$0xf0] }
  0x17   : > { %222 = vmatpush.bf16.msra.mxu1 %v526_v7  ;;  %v506_v17 = vor.u32 %v538_v13, %v505_v12  ;;  %v510_v18 = vor.u32 %v537_v15, %v507_v16  ;;  %v497_v19 = vld [vmem:[%s869_s1 + $0x10] sm:$0xf]  ;;  %v536_v20 = vld [vmem:[%s869_s1 + $0x14] sm:$0xf0]  ;;  %s136_s30 = scalar_select %p135_p10, %s708_s13, 1  ;;  %v234_v21 = vand.u32 127, %v233_v14 }
  0x18   : > { %v535_v22 = vld [vmem:[%s869_s1 + $0x14] sm:$0xf]  ;;  %v499_v23 = vld [vmem:[%s869_s1 + $0x18] sm:$0xf0]  ;;  %v498_v24 = vor.u32 %v536_v20, %v497_v19  ;;  %v489_v26 = vld [vmem:[%s869_s1] sm:$0xf] }
  0x19   : > { %s486_s7 = sshll.u32 %s136_s30, 3  ;;  %v502_v25 = vor.u32 %v535_v22, %v499_v23  ;;  %v534_v27 = vld [vmem:[%s869_s1 + $0x4] sm:$0xf0]  ;;  %vm235_vm0 = vcmp.lt.s32.totalorder %v234_v21, 32  ;;  %v533_v29 = vld [vmem:[%s869_s1 + $0x4] sm:$0xf] }
  0x1a   : > { %210 = vmatpush.bf16.msra.mxu0 %v514_v10  ;;  %s138_s16 = scalar_lea.vmem %s868_s0, %s486_s7  ;;  %v491_v30 = vld [vmem:[%s869_s1 + $0x8] sm:$0xf0]  ;;  %v490_v32 = vor.u32 %v534_v27, %v489_v26  ;;  %vm202_vm1 = vcmask 654336   ;;  %s530_s30 = sshll.u32 %s708_s13, 3 }
  0x1b   : > { %223 = vmatpush.bf16.msra.mxu1 %v518_v11  ;;  %v140_v28 = vld [vmem:[%s138_s16] sm:$0xff]  ;;  %v494_v34 = vor.u32 %v533_v29, %v491_v30  ;;  %s417_s5 = scalar_lea.hbm %s870_s2, %s530_s30  ;;  %s419_s13 = sshll.u32 %s134_s6, 4  ;;  %s420_s13 = int_to_ptr.vmem [resolvable:$true] %s419_s13 }
  0x1c   : > { %v232_v31 = vmul.f32 %v140_v28, %v140_v28  ;;  %v151_v36 = vpack.c.bf16 %v140_v28, %v140_v28  ;;  %s421_s7 = sshll.u32 %s417_s5, 4  ;;  %s422_s7 = int_to_ptr.hbm [resolvable:$true] %s421_s7 }
  0x1d   : > { %s622_s14 = sshra.s32 %s422_s7, 4  ;;  %s623_s14 = int_to_ptr.hbm [resolvable:$true] %s622_s14 }
  0x1e   : > { %211 = vmatpush.bf16.msra.mxu0 %v506_v17  ;;  %v236_v33 = vsel %vm235_vm0, %v232_v31, 0.0  ;;  %v240_v37 = vsel %vm202_vm1, %v232_v31, 0.0  ;;  %s624_s16 = scalar_lea.hbm %s623_s14, 8  ;;  %p629_p0 = scmp.lt.s32.totalorder %s623_s14, %s870_s2 }
  0x1f   : > { %224 = vmatpush.bf16.msra.mxu1 %v510_v18  ;;  %v237_v35 = vsel %vm202_vm1, %v236_v33, 0.0  ;;  %p625_p11 = scmp.ne.s32.totalorder %s623_s14, %s624_s16  ;;  %p630_p1 = scmp.lt.s32.totalorder %s628_s22, %s624_s16 }
  0x20   : > { %238 = vadd.xlane.f32.xlu0 %v237_v35 }
  0x21   : > { %p626_p12 = pnand %p625_p11, %p725_p5  ;;  %p631_p2 = por %p630_p1, %p629_p0 }
  0x22   : > { %212 = vmatpush.bf16.msra.mxu0 %v498_v24 }
  0x23   : > { %225 = vmatpush.bf16.msra.mxu1 %v502_v25  ;;  %p627_p13 = pneg %p626_p12 }
  0x25   : > { %p632_p3 = pnand %p631_p2, %p627_p13 }
  0x26   : > { %213 = vmatpush.bf16.msra.mxu0 %v490_v32 }
  0x27   : > { %226 = vmatpush.bf16.msra.mxu1 %v494_v34 }
  0x28   : > { %241 = vadd.xlane.f32.xlu0 %v240_v37 }
  0x29   : > { %527 = vmatmul.msk.bf16.vlgmr.msra.gmra.mxu0 %vm202_vm1, %v151_v36 }
  0x2a   : > { %528 = vmatmul.msk.bf16.vlgmr.msra.gmra.mxu1 %vm202_vm1, %v151_v36 }
  0x93   : > { %v239_v45 = vpop.xlane.xlu0 %238 }
  0x94   : > { %v244_v46 = vmax.f32 %v239_v45, 1e-10 }
  0x96   : > { %582 = vrsqrt.f32 %v244_v46  ;;  %vm251_vm2 = vweird.f32 %v244_v46 }
  0x9b   : > { %v242_v47 = vpop.xlane.xlu0 %241 }
  0x9c   : > { %v243_v48 = vsub.f32 %v242_v47, %v239_v45  ;;  %v583_v50 = vpop.eup %582 }
  0x9d   : > { %v246_v51 = vmul.f32 %v583_v50, %v244_v46  ;;  %vm252_vm3 = vweird.f32 %v583_v50 }
  0x9e   : > { %v308_v49 = vmax.f32 %v243_v48, 1e-10  ;;  %vm253_vm4 = vmor %vm251_vm2, %vm252_vm3 }
  0x9f   : > { %v247_v52 = vmul.f32 %v583_v50, %v246_v51 }
  0xa0   : > { %584 = vrsqrt.f32 %v308_v49  ;;  %vm315_vm5 = vweird.f32 %v308_v49 }
  0xa1   : > { %v248_v54 = vmul.f32 0.5, %v247_v52 }
  0xa3   : > { %v249_v56 = vsub.f32 1.5, %v248_v54 }
  0xa5   : > { %v250_v59 = vmul.f32 %v583_v50, %v249_v56 }
  0xa6   : > { %v800_v38 = vpop.f32.mrf.mxu0  ;;  %v585_v53 = vpop.eup %584 }
  0xa7   : > { %v802_v39 = vpop.f32.mrf.mxu1  ;;  %v256_v40 = vmul.f32 %v800_v38, %v800_v38  ;;  %v310_v55 = vmul.f32 %v585_v53, %v308_v49  ;;  %v254_v61 = vsel %vm253_vm4, %v583_v50, %v250_v59  ;;  %vm316_vm6 = vweird.f32 %v585_v53 }
  0xa8   : > { %v373_v41 = vmul.f32 %v802_v39, %v800_v38  ;;  %v320_v42 = vmul.f32 %v802_v39, %v802_v39  ;;  %v255_v62 = vmul.f32 %v254_v61, %v244_v46  ;;  %vm317_vm7 = vmor %vm315_vm5, %vm316_vm6 }
  0xa9   : > { %257 = vadd.xlane.f32.xlu1 %v256_v40  ;;  %v311_v57 = vmul.f32 %v585_v53, %v310_v55 }
  0xaa   : > { %374 = vadd.xlane.f32.xlu2 %v373_v41  ;;  %v272_v0 = vmin.f32 %v255_v62, 0.99999 }
  0xab   : > { %v312_v58 = vmul.f32 0.5, %v311_v57 }
  0xac   : > { %v273_v3 = vadd.f32 1.0, %v272_v0  ;;  %v276_v5 = vsub.f32 1.0, %v272_v0 }
  0xad   : > { %v313_v60 = vsub.f32 1.5, %v312_v58 }
  0xae   : > { %v217_v43 = vpop.f32.mrf.mxu0 }
  0xaf   : > { %v230_v44 = vpop.f32.mrf.mxu1  ;;  %v314_v63 = vmul.f32 %v585_v53, %v313_v60 }
  0xb1   : > { %321 = vadd.xlane.f32.xlu1 %v320_v42  ;;  %v318_v1 = vsel %vm317_vm7, %v585_v53, %v314_v63 }
  0xb2   : > { %v319_v4 = vmul.f32 %v318_v1, %v308_v49 }
  0xb4   : > { %v336_v7 = vmin.f32 %v319_v4, 0.99999 }
  0xb6   : > { %v337_v10 = vadd.f32 1.0, %v336_v7  ;;  %v340_v12 = vsub.f32 1.0, %v336_v7 }
 0x11c   : > { %v810_v2 = vpop.xlane.xlu1 %257 }
 0x11d   : > { %vm259_vm8 = vcmp.gt.f32.partialorder %v810_v2, 0.0 }
 0x11e   : > { %v260_v6 = vsel %vm259_vm8, %v810_v2, 1.0 }
 0x11f   : > { %586 = vrsqrt.f32 %v260_v6  ;;  %vm267_vm11 = vweird.f32 %v260_v6 }
 0x120   : > { %588 = vlog2.f32 %v273_v3 }
 0x121   : > { %590 = vlog2.f32 %v276_v5 }
 0x124   : > { %v816_v8 = vpop.xlane.xlu1 %321 }
 0x125   : > { %v587_v9 = vpop.eup %586  ;;  %vm323_vm9 = vcmp.gt.f32.partialorder %v816_v8, 0.0 }
 0x126   : > { %v262_v11 = vmul.f32 %v587_v9, %v260_v6  ;;  %v324_v13 = vsel %vm323_vm9, %v816_v8, 1.0  ;;  %v589_v14 = vpop.eup %588  ;;  %vm268_vm10 = vweird.f32 %v587_v9 }
 0x127   : > { %592 = vrsqrt.f32 %v324_v13  ;;  %v591_v15 = vpop.eup %590  ;;  %v275_v18 = vmul.f32 0.6931472, %v589_v14  ;;  %vm269_vm12 = vmor %vm267_vm11, %vm268_vm10  ;;  %vm331_vm14 = vweird.f32 %v324_v13 }
 0x128   : > { %v263_v16 = vmul.f32 %v587_v9, %v262_v11  ;;  %594 = vlog2.f32 %v337_v10  ;;  %v278_v19 = vmul.f32 0.6931472, %v591_v15 }
 0x129   : > { %596 = vlog2.f32 %v340_v12 }
 0x12a   : > { %v264_v17 = vmul.f32 0.5, %v263_v16  ;;  %v279_v25 = vsub.f32 %v275_v18, %v278_v19 }
 0x12c   : > { %v265_v20 = vsub.f32 1.5, %v264_v17  ;;  %v280_v31 = vmul.f32 0.5, %v279_v25 }
 0x12d   : > { %v593_v21 = vpop.eup %592 }
 0x12e   : > { %v266_v22 = vmul.f32 %v587_v9, %v265_v20  ;;  %v326_v23 = vmul.f32 %v593_v21, %v324_v13  ;;  %v595_v24 = vpop.eup %594  ;;  %vm332_vm13 = vweird.f32 %v593_v21 }
 0x12f   : > { %v597_v26 = vpop.eup %596  ;;  %v339_v33 = vmul.f32 0.6931472, %v595_v24  ;;  %vm333_vm15 = vmor %vm331_vm14, %vm332_vm13 }
 0x130   : > { %v270_v27 = vsel %vm269_vm12, %v587_v9, %v266_v22  ;;  %v327_v28 = vmul.f32 %v593_v21, %v326_v23  ;;  %v342_v34 = vmul.f32 0.6931472, %v597_v26  ;;  %v375_v23 = vpop.xlane.xlu2 %374 }
 0x131   : > { %v271_v29 = vmul.f32 %v270_v27, %v810_v2 }
 0x132   : > { %v328_v30 = vmul.f32 0.5, %v327_v28  ;;  %v343_v41 = vsub.f32 %v339_v33, %v342_v34 }
 0x133   : > { %v281_v32 = vmul.f32 %v271_v29, %v254_v61 }
 0x134   : > { %v329_v35 = vsub.f32 1.5, %v328_v30  ;;  %v344_v44 = vmul.f32 0.5, %v343_v41 }
 0x135   : > { %v282_v36 = vmul.f32 %v281_v32, %v280_v31 }
 0x136   : > { %v330_v37 = vmul.f32 %v593_v21, %v329_v35 }
 0x137   : > { %v283_v40 = vmin.f32 %v282_v36, 15.0 }
 0x138   : > { %v334_v42 = vsel %vm333_vm15, %v593_v21, %v330_v37 }
 0x139   : > { %598 = vtanh.f32 %v283_v40  ;;  %v335_v43 = vmul.f32 %v334_v42, %v816_v8 }
 0x13b   : > { %v345_v45 = vmul.f32 %v335_v43, %v318_v1 }
 0x13d   : > { %v346_v46 = vmul.f32 %v345_v45, %v344_v44 }
 0x13f   : > { %v599_v47 = vpop.eup %598  ;;  %v347_v48 = vmin.f32 %v346_v46, 15.0 }
 0x140   : > { %v287_v49 = vmax.f32 %v599_v47, 1e-05  ;;  %v285_v6 = vmul.f32 %v599_v47, %v270_v27 }
 0x141   : > { %600 = vtanh.f32 %v347_v48 }
 0x142   : > { %602 = vrcp.f32 %v287_v49  ;;  %v300_v55 = vand.u32 2147483648, %v287_v49  ;;  %v298_v57 = vand.u32 2147483647, %v287_v49  ;;  %vm294_vm1 = vweird.f32 %v287_v49 }
 0x143   : > { %vm288_vm6 = vcmp.gt.f32.partialorder %v287_v49, 0.999  ;;  %v286_v14 = vsel %vm259_vm8, %v285_v6, 0.0 }
 0x144   : > { %v301_v60 = vor.u32 1.1754944e-38, %v300_v55  ;;  %vm299_vm3 = vcmp.eq.f32.partialorder %v298_v57, 8.507059e+37 }
 0x147   : > { %v601_v50 = vpop.eup %600 }
 0x148   : > { %v603_v51 = vpop.eup %602  ;;  %v351_v52 = vmax.f32 %v601_v50, 1e-05  ;;  %v349_v11 = vmul.f32 %v601_v50, %v334_v42 }
 0x149   : > { %v290_v53 = vmul.f32 %v603_v51, %v287_v49  ;;  %vm295_vm0 = vweird.f32 %v603_v51 }
 0x14a   : > { %604 = vrcp.f32 %v351_v52  ;;  %vm296_vm2 = vmor %vm294_vm1, %vm295_vm0  ;;  %v364_v1 = vand.u32 2147483648, %v351_v52  ;;  %v362_v5 = vand.u32 2147483647, %v351_v52  ;;  %vm358_vm5 = vweird.f32 %v351_v52 }
 0x14b   : > { %v291_v54 = vsub.f32 1.0, %v290_v53  ;;  %vm352_vm11 = vcmp.gt.f32.partialorder %v351_v52, 0.999  ;;  %v350_v17 = vsel %vm323_vm9, %v349_v11, 0.0 }
 0x14c   : > { %v365_v9 = vor.u32 1.1754944e-38, %v364_v1  ;;  %vm363_vm10 = vcmp.eq.f32.partialorder %v362_v5, 8.507059e+37 }
 0x14d   : > { %v292_v56 = vmul.f32 %v603_v51, %v291_v54 }
 0x14f   : > { %v293_v58 = vadd.f32 %v603_v51, %v292_v56 }
 0x150   : > { %v605_v59 = vpop.eup %604 }
 0x151   : > { %v297_v61 = vsel %vm296_vm2, %v603_v51, %v293_v58  ;;  %v354_v62 = vmul.f32 %v605_v59, %v351_v52  ;;  %vm359_vm4 = vweird.f32 %v605_v59 }
 0x152   : > { %v302_v63 = vsel %vm299_vm3, %v301_v60, %v297_v61  ;;  %vm360_vm7 = vmor %vm358_vm5, %vm359_vm4 }
 0x153   : > { %v355_v0 = vsub.f32 1.0, %v354_v62  ;;  %v303_v3 = vmul.f32 0.999, %v302_v63 }
 0x155   : > { %v356_v4 = vmul.f32 %v605_v59, %v355_v0  ;;  %v304_v10 = vsel %vm288_vm6, %v303_v3, 1.0 }
 0x156   : > { %v305_v16 = vmul.f32 %v304_v10, %v286_v14 }
 0x157   : > { %v357_v7 = vadd.f32 %v605_v59, %v356_v4 }
 0x158   : > { %v306_v20 = vmul.f32 %v305_v16, %v305_v16 }
 0x159   : > { %v361_v12 = vsel %vm360_vm7, %v605_v59, %v357_v7 }
 0x15a   : > { %v366_v13 = vsel %vm363_vm10, %v365_v9, %v361_v12  ;;  %v307_v26 = vmul.f32 %v306_v20, %v810_v2 }
 0x15b   : > { %v367_v15 = vmul.f32 0.999, %v366_v13 }
 0x15c   : > { %v399_v2 = vsub.f32 1.0, %v307_v26 }
 0x15d   : > { %v368_v18 = vsel %vm352_vm11, %v367_v15, 1.0 }
 0x15e   : > { %v369_v19 = vmul.f32 %v368_v18, %v350_v17 }
 0x160   : > { %v370_v21 = vmul.f32 %v369_v19, %v369_v19  ;;  %v372_v22 = vmul.f32 %v369_v19, %v305_v16  ;;  %v400_v43 = vmul.f32 %v399_v2, %v369_v19 }
 0x162   : > { %v371_v24 = vmul.f32 %v370_v21, %v816_v8  ;;  %v376_v25 = vmul.f32 %v375_v23, %v372_v22 }
 0x164   : > { %v377_v27 = vmul.f32 2.0, %v376_v25  ;;  %v379_v29 = vmul.f32 %v371_v24, %v307_v26 }
 0x166   : > { %v378_v28 = vadd.f32 1.0, %v377_v27 }
 0x168   : > { %v380_v30 = vadd.f32 %v379_v29, %v378_v28  ;;  %v396_v36 = vadd.f32 %v378_v28, %v371_v24 }
 0x16a   : > { %v381_v31 = vadd.f32 1e-05, %v380_v30  ;;  %v397_v42 = vmul.f32 %v396_v36, %v305_v16 }
 0x16c   : > { %606 = vrcp.f32 %v381_v31  ;;  %v393_v35 = vand.u32 2147483648, %v381_v31  ;;  %v391_v8 = vand.u32 2147483647, %v381_v31  ;;  %vm387_vm9 = vweird.f32 %v381_v31 }
 0x16e   : > { %v394_v41 = vor.u32 1.1754944e-38, %v393_v35  ;;  %vm392_vm13 = vcmp.eq.f32.partialorder %v391_v8, 8.507059e+37 }
 0x172   : > { %v607_v32 = vpop.eup %606 }
 0x173   : > { %v383_v33 = vmul.f32 %v607_v32, %v381_v31  ;;  %vm388_vm8 = vweird.f32 %v607_v32 }
 0x174   : > { %vm389_vm12 = vmor %vm387_vm9, %vm388_vm8 }
 0x175   : > { %v384_v34 = vsub.f32 1.0, %v383_v33 }
 0x177   : > { %v385_v37 = vmul.f32 %v607_v32, %v384_v34 }
 0x179   : > { %v386_v40 = vadd.f32 %v607_v32, %v385_v37 }
 0x17b   : > { %v390_v44 = vsel %vm389_vm12, %v607_v32, %v386_v40 }
 0x17c   : > { %v395_v45 = vsel %vm392_vm13, %v394_v41, %v390_v44 }
 0x17d   : > { %v398_v46 = vmul.f32 %v397_v42, %v395_v45  ;;  %v401_v47 = vmul.f32 %v400_v43, %v395_v45 }
 0x17f   : > { %v402_v48 = vmul.f32 %v398_v46, %v800_v38  ;;  %v403_v49 = vmul.f32 %v401_v47, %v802_v39 }
 0x181   : > { %v404_v50 = vadd.f32 %v403_v49, %v402_v48 }
 0x183   : > { %405 = vst [vmem:[%s134_s6] sm:$0xff] %v404_v50 }
 0x184   : > { %635 = shalt.err (!%p632_p3)
}
 0x185   : > { %543 = dma.vmem_to_hbm [thread:$0]  (%p725_p5), %s420_s13, 128, %s422_s7, %s407_s8  }
 0x186 PF: > { %p549_p4 = scmp.ge.s32.totalorder %s670_s12, 2  ;;  %s433_s25 = sand.u32 1, %s658_s9  }
 0x187   : > { %s434_s26 = scalar_lea.sflag [#allocation3], %s433_s25 }
 0x188   : > { %p546_p7 = pnand %p549_p4, %p729_p6 }
 0x18a   : > { %p547_p8 = pneg %p546_p7 }
 0x18c   : > { %653 = dma.done.wait (%p547_p8), %s434_s26, 128  }
 0x18d   : > { %655 = vsyncadd (%p547_p8), %s434_s26, 4294967168  ;;  %p12_p9 = scmp.ge.s32.totalorder %s712_s15, 4   ;;  %s873_s9 = smov %s662_s10 }
 0x18e   : > { %s874_s10 = smov %s666_s11  ;;  %s875_s11 = smov %s723_s18 }
 0x18f   : > { %s876_s12 = smov %s712_s15  ;;  %14 = sbr.rel (!%p12_p9) target bundleno = 3 (0x3), region = 63 }
 0x194   :  { %440 = vsyncpa [#allocation3], 1 }
 0x195   :  { %442 = vsyncpa [#allocation3 + $0x1], 1 }

</bundles_post_ra>
